<compile_context>
chip_gen: v7x
topology: tpu7x:2x2x1
jax: 0.10.0
libtpu: 0.0.40
codegen_flags: <defaults>
</compile_context>

<pallas_src>
import jax
import jax.numpy as jnp
from jax import lax
from jax.experimental import pallas as pl
from jax.experimental.pallas import tpu as pltpu


def mlp_kernel(x_ref, w1_ref, w2_ref, w3_ref, w4_ref, b_ref, o_ref):
    x = x_ref[...]                                               # (BM, F) natural layout

    b1 = b_ref[0:32, :]                                          # (32, 1)
    b2 = b_ref[32:48, :]                                         # (16, 1)
    b3 = b_ref[48:56, :]                                         # ( 8, 1)
    b4 = b_ref[56:57, :]                                         # ( 1, 1)

    # Layer 1: W1 (32,F) x X^T  -> (32, BM); contraction on the last dims of
    # both operands (transposed-RHS matmul, handled natively by the MXU).
    h = lax.dot_general(w1_ref[...], x, (((1,), (1,)), ((), ())),
                        preferred_element_type=jnp.float32) + b1
    h = jnp.maximum(h, 0.0)                                      # (32, BM)

    h = jnp.dot(w2_ref[...], h, preferred_element_type=jnp.float32) + b2
    h = jnp.maximum(h, 0.0)                                      # (16, BM)

    h = jnp.dot(w3_ref[...], h, preferred_element_type=jnp.float32) + b3
    h = jnp.maximum(h, 0.0)                                      # (8, BM)

    h = jnp.dot(w4_ref[...], h, preferred_element_type=jnp.float32) + b4
    o_ref[...] = jax.nn.sigmoid(h).astype(o_ref.dtype)           # (1, BM)


def _round_up(a, m):
    return ((a + m - 1) // m) * m


def net_forward(x, params, *, block_m=1024):
    """x: [B, F] float32; params: PyTorch-layout weights (out,in), biases (out,)."""
    B, F = x.shape

    # --- choose a lane-dense batch tile ------------------------------------
    B_lanes = _round_up(B, 128)                        # minimum lane-dense width
    bm = min(_round_up(block_m, 128), B_lanes)
    # Prefer >= 2 grid steps (v7x megacore) when the batch cleanly allows it.
    if bm == B_lanes and B_lanes >= 256 and (B_lanes // 2) % 128 == 0:
        bm = B_lanes // 2
    B_pad = _round_up(B, bm)
    grid = (B_pad // bm,)

    # --- wrapper-side plumbing: pad batch only (no transpose) --------------
    x_pad = jnp.pad(x, ((0, B_pad - B), (0, 0)))       # (B_pad, F)
    w1, w2, w3, w4 = params["w1"], params["w2"], params["w3"], params["w4"]
    b_packed = jnp.concatenate(
        [params["b1"], params["b2"], params["b3"], params["b4"]]).reshape(57, 1)

    def rep(shape):
        nd = len(shape)
        return pl.BlockSpec(shape, lambda i, _nd=nd: (0,) * _nd)  # replicated block

    in_specs = [
        pl.BlockSpec((bm, F), lambda i: (i, 0)),       # natural-layout batch tile
        rep(w1.shape), rep(w2.shape), rep(w3.shape), rep(w4.shape),
        rep(b_packed.shape),
    ]
    out_spec = pl.BlockSpec((1, bm), lambda i: (0, i))  # lane-dense output row

    flops = 2 * B_pad * (F * 32 + 32 * 16 + 16 * 8 + 8 * 1)
    bytes_accessed = 4 * (B_pad * F + B_pad
                          + w1.size + w2.size + w3.size + w4.size + 57)
    cost = pl.CostEstimate(flops=flops,
                           transcendentals=B_pad,      # sigmoid
                           bytes_accessed=bytes_accessed)

    yT = pl.pallas_call(
        mlp_kernel,
        out_shape=jax.ShapeDtypeStruct((1, B_pad), jnp.float32),
        grid_spec=pltpu.PrefetchScalarGridSpec(
            num_scalar_prefetch=0,
            grid=grid,
            in_specs=in_specs,
            out_specs=out_spec,
        ),
        compiler_params=pltpu.CompilerParams(
            dimension_semantics=("parallel",)),
        cost_estimate=cost,
    )(x_pad, w1, w2, w3, w4, b_packed)

    return yT[0, :B].reshape(B, 1)


def init_params(key, features):
    """Deterministic init mimicking nn.Linear defaults; PyTorch (out,in) layout."""
    dims = [(features, 32), (32, 16), (16, 8), (8, 1)]
    params = {}
    for idx, (fan_in, fan_out) in enumerate(dims, start=1):
        key, kw, kb = jax.random.split(key, 3)
        bound = 1.0 / jnp.sqrt(fan_in)
        params[f"w{idx}"] = jax.random.uniform(
            kw, (fan_out, fan_in), jnp.float32, -bound, bound)
        params[f"b{idx}"] = jax.random.uniform(
            kb, (fan_out,), jnp.float32, -bound, bound)
    return params


def reference_forward(x, params):
    h = x
    for idx in range(1, 4):
        h = jnp.maximum(h @ params[f"w{idx}"].T + params[f"b{idx}"], 0.0)
    h = h @ params["w4"].T + params["b4"]
    return jax.nn.sigmoid(h)


if __name__ == "__main__":
    key = jax.random.PRNGKey(0)
    features = 16

    # Small primary test (matches the module's tiny-MLP use case).
    batch = 16
    kx, kp = jax.random.split(key)
    x = jax.random.normal(kx, (batch, features), jnp.float32)
    params = init_params(kp, features)

    out = jax.block_until_ready(net_forward(x, params))
    ref = reference_forward(x, params)
    assert out.shape == (batch, 1)
    assert jnp.allclose(out, ref, atol=1e-4, rtol=1e-4), "mismatch vs reference"

    # Secondary check: ragged batch + multi-step grid (exercises padding and
    # the pipelined batch tiling).
    batch2 = 300
    x2 = jax.random.normal(jax.random.PRNGKey(1), (batch2, features), jnp.float32)
    out2 = jax.block_until_ready(net_forward(x2, params, block_m=128))
    ref2 = reference_forward(x2, params)
    assert out2.shape == (batch2, 1)
    assert jnp.allclose(out2, ref2, atol=1e-4, rtol=1e-4), "mismatch vs reference (ragged)"

    print("KERNEL_OK")
</pallas_src>

<mosaic_0001>
module attributes {stable_mosaic.version = 11 : i64} {
  func.func @mlp_kernel(%arg0: i32, %arg1: memref<128x16xf32, #tpu.memory_space<vmem>>, %arg2: memref<32x16xf32, #tpu.memory_space<vmem>>, %arg3: memref<16x32xf32, #tpu.memory_space<vmem>>, %arg4: memref<8x16xf32, #tpu.memory_space<vmem>>, %arg5: memref<1x8xf32, #tpu.memory_space<vmem>>, %arg6: memref<57x1xf32, #tpu.memory_space<vmem>>, %arg7: memref<1x128xf32, #tpu.memory_space<vmem>>) attributes {dimension_semantics = [#tpu.dimension_semantics<parallel>], iteration_bounds = array<i64: 1>, scalar_prefetch = 0 : i64, scratch_operands = 0 : i64, tpu.core_type = #tpu.core_type<tc>, window_params = [{transform_indices = @transform_0, window_bounds = array<i64: 128, 16>}, {pipeline_mode = #tpu.pipeline_mode<synchronous>, transform_indices = @transform_1, window_bounds = array<i64: 32, 16>}, {pipeline_mode = #tpu.pipeline_mode<synchronous>, transform_indices = @transform_2, window_bounds = array<i64: 16, 32>}, {pipeline_mode = #tpu.pipeline_mode<synchronous>, transform_indices = @transform_3, window_bounds = array<i64: 8, 16>}, {pipeline_mode = #tpu.pipeline_mode<synchronous>, transform_indices = @transform_4, window_bounds = array<i64: 1, 8>}, {pipeline_mode = #tpu.pipeline_mode<synchronous>, transform_indices = @transform_5, window_bounds = array<i64: 57, 1>}, {transform_indices = @transform_6, window_bounds = array<i64: 1, 128>}]} {
    %c0 = arith.constant 0 : index
    %c0_0 = arith.constant 0 : index
    %0 = vector.load %arg1[%c0, %c0_0] : memref<128x16xf32, #tpu.memory_space<vmem>>, vector<128x16xf32>
    %c0_1 = arith.constant 0 : index
    %c0_2 = arith.constant 0 : index
    %1 = vector.load %arg6[%c0_1, %c0_2] : memref<57x1xf32, #tpu.memory_space<vmem>>, vector<32x1xf32>
    %c32 = arith.constant 32 : index
    %c0_3 = arith.constant 0 : index
    %2 = vector.load %arg6[%c32, %c0_3] : memref<57x1xf32, #tpu.memory_space<vmem>>, vector<16x1xf32>
    %c48 = arith.constant 48 : index
    %c0_4 = arith.constant 0 : index
    %3 = vector.load %arg6[%c48, %c0_4] : memref<57x1xf32, #tpu.memory_space<vmem>>, vector<8x1xf32>
    %c56 = arith.constant 56 : index
    %c0_5 = arith.constant 0 : index
    %4 = vector.load %arg6[%c56, %c0_5] : memref<57x1xf32, #tpu.memory_space<vmem>>, vector<1x1xf32>
    %c0_6 = arith.constant 0 : index
    %c0_7 = arith.constant 0 : index
    %5 = vector.load %arg2[%c0_6, %c0_7] : memref<32x16xf32, #tpu.memory_space<vmem>>, vector<32x16xf32>
    %cst = arith.constant dense<0.000000e+00> : vector<32x128xf32>
    %6 = tpu.matmul %5, %0, %cst {dimension_numbers = #tpu.dot_dimension_numbers<[1], [1], [0], [0], [0, 0, 1, 0], [], []>} : vector<32x16xf32>, vector<128x16xf32>, vector<32x128xf32> -> vector<32x128xf32>
    %7 = vector.broadcast %1 : vector<32x1xf32> to vector<32x128xf32>
    %8 = arith.addf %6, %7 : vector<32x128xf32>
    %cst_8 = arith.constant 0.000000e+00 : f32
    %9 = vector.broadcast %cst_8 : f32 to vector<32x128xf32>
    %10 = arith.maximumf %8, %9 : vector<32x128xf32>
    %c0_9 = arith.constant 0 : index
    %c0_10 = arith.constant 0 : index
    %11 = vector.load %arg3[%c0_9, %c0_10] : memref<16x32xf32, #tpu.memory_space<vmem>>, vector<16x32xf32>
    %cst_11 = arith.constant dense<0.000000e+00> : vector<16x128xf32>
    %12 = tpu.matmul %11, %10, %cst_11 {dimension_numbers = #tpu.dot_dimension_numbers<[1], [0], [0], [1], [0, 0, 1, 1], [], []>} : vector<16x32xf32>, vector<32x128xf32>, vector<16x128xf32> -> vector<16x128xf32>
    %13 = vector.broadcast %2 : vector<16x1xf32> to vector<16x128xf32>
    %14 = arith.addf %12, %13 : vector<16x128xf32>
    %cst_12 = arith.constant 0.000000e+00 : f32
    %15 = vector.broadcast %cst_12 : f32 to vector<16x128xf32>
    %16 = arith.maximumf %14, %15 : vector<16x128xf32>
    %c0_13 = arith.constant 0 : index
    %c0_14 = arith.constant 0 : index
    %17 = vector.load %arg4[%c0_13, %c0_14] : memref<8x16xf32, #tpu.memory_space<vmem>>, vector<8x16xf32>
    %cst_15 = arith.constant dense<0.000000e+00> : vector<8x128xf32>
    %18 = tpu.matmul %17, %16, %cst_15 {dimension_numbers = #tpu.dot_dimension_numbers<[1], [0], [0], [1], [0, 0, 1, 1], [], []>} : vector<8x16xf32>, vector<16x128xf32>, vector<8x128xf32> -> vector<8x128xf32>
    %19 = vector.broadcast %3 : vector<8x1xf32> to vector<8x128xf32>
    %20 = arith.addf %18, %19 : vector<8x128xf32>
    %cst_16 = arith.constant 0.000000e+00 : f32
    %21 = vector.broadcast %cst_16 : f32 to vector<8x128xf32>
    %22 = arith.maximumf %20, %21 : vector<8x128xf32>
    %c0_17 = arith.constant 0 : index
    %c0_18 = arith.constant 0 : index
    %23 = vector.load %arg5[%c0_17, %c0_18] : memref<1x8xf32, #tpu.memory_space<vmem>>, vector<1x8xf32>
    %cst_19 = arith.constant dense<0.000000e+00> : vector<1x128xf32>
    %24 = tpu.matmul %23, %22, %cst_19 {dimension_numbers = #tpu.dot_dimension_numbers<[1], [0], [0], [1], [0, 0, 1, 1], [], []>} : vector<1x8xf32>, vector<8x128xf32>, vector<1x128xf32> -> vector<1x128xf32>
    %25 = vector.broadcast %4 : vector<1x1xf32> to vector<1x128xf32>
    %26 = arith.addf %24, %25 : vector<1x128xf32>
    %27 = arith.negf %26 : vector<1x128xf32>
    %28 = math.exp %27 : vector<1x128xf32>
    %cst_20 = arith.constant 1.000000e+00 : f32
    %29 = vector.broadcast %cst_20 : f32 to vector<1x128xf32>
    %30 = arith.addf %29, %28 : vector<1x128xf32>
    %31 = arith.divf %29, %30 : vector<1x128xf32>
    %c0_21 = arith.constant 0 : index
    %c0_22 = arith.constant 0 : index
    %32 = vector.load %arg7[%c0_21, %c0_22] : memref<1x128xf32, #tpu.memory_space<vmem>>, vector<1x128xf32>
    tpu.vector_store %arg7[%c0_21, %c0_22], %31 {strides = array<i32>} : memref<1x128xf32, #tpu.memory_space<vmem>>, vector<1x128xf32>,
    return
  }
  func.func @transform_0(%arg0: i32) -> (i32, i32) {
    %c0_i32 = arith.constant 0 : i32
    %c0_i32_0 = arith.constant 0 : i32
    return %arg0, %c0_i32 : i32, i32
  }
  func.func @transform_1(%arg0: i32) -> (i32, i32) {
    %c0_i32 = arith.constant 0 : i32
    %c0_i32_0 = arith.constant 0 : i32
    %c0_i32_1 = arith.constant 0 : i32
    return %c0_i32, %c0_i32_0 : i32, i32
  }
  func.func @transform_2(%arg0: i32) -> (i32, i32) {
    %c0_i32 = arith.constant 0 : i32
    %c0_i32_0 = arith.constant 0 : i32
    %c0_i32_1 = arith.constant 0 : i32
    return %c0_i32, %c0_i32_0 : i32, i32
  }
  func.func @transform_3(%arg0: i32) -> (i32, i32) {
    %c0_i32 = arith.constant 0 : i32
    %c0_i32_0 = arith.constant 0 : i32
    %c0_i32_1 = arith.constant 0 : i32
    return %c0_i32, %c0_i32_0 : i32, i32
  }
  func.func @transform_4(%arg0: i32) -> (i32, i32) {
    %c0_i32 = arith.constant 0 : i32
    %c0_i32_0 = arith.constant 0 : i32
    %c0_i32_1 = arith.constant 0 : i32
    return %c0_i32, %c0_i32_0 : i32, i32
  }
  func.func @transform_5(%arg0: i32) -> (i32, i32) {
    %c0_i32 = arith.constant 0 : i32
    %c0_i32_0 = arith.constant 0 : i32
    %c0_i32_1 = arith.constant 0 : i32
    return %c0_i32, %c0_i32_0 : i32, i32
  }
  func.func @transform_6(%arg0: i32) -> (i32, i32) {
    %c0_i32 = arith.constant 0 : i32
    %c0_i32_0 = arith.constant 0 : i32
    return %c0_i32, %arg0 : i32, i32
  }
}

</mosaic_0001>

<bundles_post_ra>
// kernel: tpu_custom_call.1
= control target key start
LH: loop header
LB: loop body
LE: loop exit
PB: predicated region body
PF: predicated region fallthrough
CT: control target
= control target key end

     0   :  { %vm72_vm0 = vcmask 130048   ;;  %v710_v6 = vmov 0   ;;  %s905_s0 = inlined_call_operand.vmem [shape: f32[128,16], index: 0, kind: input, shape index: {}]   ;;  %s906_s1 = inlined_call_operand.vmem [shape: f32[32,16], index: 1, kind: input, shape index: {}]   ;;  %s907_s2 = inlined_call_operand.vmem [shape: f32[16,32], index: 2, kind: input, shape index: {}]   ;;  %s908_s3 = inlined_call_operand.vmem [shape: f32[8,16], index: 3, kind: input, shape index: {}]   ;;  %s909_s4 = inlined_call_operand.vmem [shape: f32[1,8], index: 4, kind: input, shape index: {}]   ;;  %s910_s5 = inlined_call_operand.vmem [shape: f32[57,1], index: 5, kind: input, shape index: {}]   ;;  %s911_s6 = inlined_call_operand.hbm [shape: f32[1,128], index: 6, kind: output, shape index: {}]  }
   0x1   :  { %v24_v0 = vld [vmem:[%s905_s0] sm:$0xff]  ;;  %v25_v1 = vld [vmem:[%s905_s0 + $0x8] sm:$0xff]  ;;  %v26_v2 = vld [vmem:[%s905_s0 + $0x10] sm:$0xff]  ;;  %680 = vset.pattern.permute.xlu0 %v710_v6  ;;  %681 = vset.pattern.permute.xlu1 %v710_v6 }
   0x2   :  { %v616_v3 = vpack.c.bf16 %v25_v1, %v24_v0  ;;  %vm761_vm1 = vmpackc.low %vm72_vm0, %vm72_vm0  ;;  %v27_v5 = vld [vmem:[%s905_s0 + $0x18] sm:$0xff]  ;;  %v48_v8 = vld [vmem:[%s906_s1] sm:$0xff] }
   0x3   :  { %v622_v7 = vpack.c.bf16 %v27_v5, %v26_v2  ;;  %v28_v9 = vld [vmem:[%s905_s0 + $0x20] sm:$0xff]  ;;  %v29_v10 = vld [vmem:[%s905_s0 + $0x28] sm:$0xff]  ;;  %587 = vmatprep.mubr.msk.f32.mxu0 %vm72_vm0, %v48_v8  ;;  %v42_v12 = vld [vmem:[%s910_s5 + $0x10] sm:$0xff] }
   0x4   :  { %618 = vmatprep.subr.msk.bf16.mxu0 %vm761_vm1, %v616_v3  ;;  %v40_v11 = vld [vmem:[%s910_s5] sm:$0xff]  ;;  %64 = vperm.xlu1 %681, %v42_v12   ;;  %v628_v13 = vpack.c.bf16 %v29_v10, %v28_v9  ;;  %v41_v14 = vld [vmem:[%s910_s5 + $0x8] sm:$0xff] }
   0x5   :  { %621 = vmatpush3.bf16.xpose.msk.msra.mxu0 %vm761_vm1, %v616_v3  ;;  %54 = vperm.xlu0 %680, %v40_v11  }
   0x6   :  { %624 = vmatprep.subr.msk.bf16.mxu0 %vm761_vm1, %v622_v7 }
   0x7   :  { %11 = vsyncpa [#allocation3], 0  ;;  %v43_v15 = vld [vmem:[%s910_s5 + $0x18] sm:$0xff]  ;;  %v44_v16 = vld [vmem:[%s910_s5 + $0x20] sm:$0xff]  ;;  %vm234_vm2 = vcmask 261120   ;;  %v711_v58 = vmov 0.0|0.0  }
   0x8   :  { %69 = vperm.xlu1 %681, %v43_v15   ;;  %v30_v17 = vld [vmem:[%s905_s0 + $0x30] sm:$0xff]  ;;  %v31_v18 = vld [vmem:[%s905_s0 + $0x38] sm:$0xff]  ;;  %v45_v19 = vld [vmem:[%s910_s5 + $0x28] sm:$0xff]  ;;  %vm712_vm3 = vmmov 0   ;;  %v713_v59 = vmov 0.0   ;;  %vm404_vm4 = vcmask 64512  }
   0x9   :  { %59 = vperm.xlu0 %680, %v41_v14   ;;  %v634_v20 = vpack.c.bf16 %v31_v18, %v30_v17  ;;  %v46_v21 = vld [vmem:[%s910_s5 + $0x30] sm:$0xff]  ;;  %v47_v22 = vld [vmem:[%s910_s5 + $0x38] sm:$0x1]  ;;  %v32_v23 = vld [vmem:[%s905_s0 + $0x40] sm:$0xff] }
   0xa   :  { %v33_v24 = vld [vmem:[%s905_s0 + $0x48] sm:$0xff]  ;;  %v34_v26 = vld [vmem:[%s905_s0 + $0x50] sm:$0xff]  ;;  %v35_v27 = vld [vmem:[%s905_s0 + $0x58] sm:$0xff] }
   0xb   :  { %v640_v25 = vpack.c.bf16 %v33_v24, %v32_v23  ;;  %v646_v28 = vpack.c.bf16 %v35_v27, %v34_v26  ;;  %v36_v29 = vld [vmem:[%s905_s0 + $0x60] sm:$0xff]  ;;  %v37_v30 = vld [vmem:[%s905_s0 + $0x68] sm:$0xff]  ;;  %v38_v32 = vld [vmem:[%s905_s0 + $0x70] sm:$0xff] }
   0xc   :  { %231 = vperm.xlu1 %681, %v45_v19   ;;  %v652_v31 = vpack.c.bf16 %v37_v30, %v36_v29  ;;  %v39_v33 = vld [vmem:[%s905_s0 + $0x78] sm:$0xff]  ;;  %v49_v35 = vld [vmem:[%s906_s1 + $0x8] sm:$0xff]  ;;  %v50_v36 = vld [vmem:[%s906_s1 + $0x10] sm:$0xff] }
   0xd   :  { %627 = vmatpush3.bf16.xpose.msk.msra.mxu0 %vm761_vm1, %v622_v7  ;;  %226 = vperm.xlu0 %680, %v44_v16   ;;  %v658_v34 = vpack.c.bf16 %v39_v33, %v38_v32  ;;  %v51_v37 = vld [vmem:[%s906_s1 + $0x18] sm:$0xff]  ;;  %v222_v38 = vld [vmem:[%s907_s2] sm:$0xff]  ;;  %v223_v57 = vld [vmem:[%s907_s2 + $0x8] sm:$0xff] }
   0xe   :  { %630 = vmatprep.subr.msk.bf16.mxu0 %vm761_vm1, %v628_v13  ;;  %601 = vmatprep.mubr.msk.f32.mxu1 %vm234_vm2, %v222_v38  ;;  %v318_v5 = vld [vmem:[%s908_s3] sm:$0xff]  ;;  %s714_s3 = smov [#allocation2]  }
   0xf   :  { %v398_v11 = vld [vmem:[%s909_s4] sm:$0x1]  ;;  %s491_s9 = sshll.u32 %s714_s3, 4  ;;  %s492_s9 = int_to_ptr.vmem [resolvable:$true] %s491_s9 }
  0x10   :  { %401 = vperm.xlu1 %681, %v47_v22   ;;  %s686_s10 = scalar_lea.vmem %s492_s9, 16  ;;  %s690_s4 = scalar_lea.vmem %s492_s9, 32 }
  0x11   :  { %321 = vperm.xlu0 %680, %v46_v21   ;;  %p687_p0 = scmp.ne.s32.totalorder %s492_s9, %s686_s10  ;;  %p691_p1 = scmp.lt.s32.totalorder %s492_s9, %s492_s9 }
  0x12   :  { %p692_p2 = scmp.lt.s32.totalorder %s690_s4, %s686_s10 }
  0x14   :  { %p693_p3 = por %p692_p2, %p691_p1 }
  0x15   :  { %633 = vmatpush3.bf16.xpose.msk.msra.mxu0 %vm761_vm1, %v628_v13 }
  0x16   :  { %636 = vmatprep.subr.msk.bf16.mxu0 %vm761_vm1, %v634_v20  ;;  %p694_p4 = pnand %p693_p3, %p687_p0 }
  0x1d   :  { %639 = vmatpush3.bf16.xpose.msk.msra.mxu0 %vm761_vm1, %v634_v20 }
  0x1e   :  { %642 = vmatprep.subr.msk.bf16.mxu0 %vm761_vm1, %v640_v25 }
  0x25   :  { %645 = vmatpush3.bf16.xpose.msk.msra.mxu0 %vm761_vm1, %v640_v25 }
  0x26   :  { %648 = vmatprep.subr.msk.bf16.mxu0 %vm761_vm1, %v646_v28 }
  0x2d   :  { %651 = vmatpush3.bf16.xpose.msk.msra.mxu0 %vm761_vm1, %v646_v28 }
  0x2e   :  { %654 = vmatprep.subr.msk.bf16.mxu0 %vm761_vm1, %v652_v31 }
  0x35   :  { %657 = vmatpush3.bf16.xpose.msk.msra.mxu0 %vm761_vm1, %v652_v31 }
  0x36   :  { %660 = vmatprep.subr.msk.bf16.mxu0 %vm761_vm1, %v658_v34 }
  0x3d   :  { %663 = vmatpush3.bf16.xpose.msk.msra.mxu0 %vm761_vm1, %v658_v34 }
  0x44   :  { %588 = vmatmul.mubr.msk.f32.vlgmr.msra.gmra.mrb[0].mxu0 %vm72_vm0, %v49_v35 }
  0x45   :  { %590 = vmatprep.mubr.msk.f32.mxu0 %vm72_vm0, %v50_v36 }
  0x48   :  { %591 = vmatmul.mubr.msk.f32.gmra.mrb[2].mxu0 %vm72_vm0, %v51_v37 }
  0x83   :  { %v65_v40 = vpop.permute.xlu1 %64 }
  0x84   :  { %v55_v39 = vpop.permute.xlu0 %54 }
  0x87   :  { %v70_v47 = vpop.permute.xlu1 %69 }
  0x88   :  { %v60_v41 = vpop.permute.xlu0 %59 }
  0x8b   :  { %v232_v60 = vpop.permute.xlu1 %231 }
  0x8c   :  { %v227_v62 = vpop.permute.xlu0 %226 }
  0x8f   :  { %v402_v12 = vpop.permute.xlu1 %401 }
  0x90   :  { %v322_v6 = vpop.permute.xlu0 %321 }
 0x117   :  { %v589_v42 = vpop.f32.mrb[0].mxu0 }
 0x118   :  { %v205_v43 = vadd.f32 %v589_v42, %v60_v41  ;;  %v199_v44 = vpop.f32.mrb[1].mxu0 }
 0x119   :  { %v200_v45 = vadd.f32 %v199_v44, %v55_v39 }
 0x11a   :  { %v219_v46 = vmax.f32 %v205_v43, 0.0 }
 0x11b   :  { %v218_v48 = vmax.f32 %v200_v45, 0.0  ;;  %v592_v49 = vpop.f32.mrb[2].mxu0 }
 0x11c   :  { %v215_v50 = vadd.f32 %v592_v49, %v70_v47  ;;  %v209_v51 = vpop.f32.mrb[3].mxu0 }
 0x11d   :  { %v210_v52 = vadd.f32 %v209_v51, %v65_v40  ;;  %v664_v53 = vpack.c.bf16 %v219_v46, %v218_v48 }
 0x11e   :  { %v221_v54 = vmax.f32 %v215_v50, 0.0 }
 0x11f   :  { %v220_v55 = vmax.f32 %v210_v52, 0.0  ;;  %665 = vmatprep.subr.bf16.mxu1 %v664_v53 }
 0x120   :  { %667 = vmatpush3.bf16.msra.mxu1 %v664_v53 }
 0x121   :  { %v668_v56 = vpack.c.bf16 %v221_v54, %v220_v55 }
 0x123   :  { %669 = vmatprep.subr.bf16.mxu1 %v668_v56 }
 0x124   :  { %671 = vmatpush3.bf16.msra.mxu1 %v668_v56 }
 0x125   :  { %672 = vmatprep.subr.bf16.mxu1 %v711_v58 }
 0x127   :  { %602 = vmatmul.mubr.msk.f32.vlgmr.msra.gmra.mrb[0].mxu1 %vm234_vm2, %v223_v57 }
 0x128   :  { %608 = vmatprep.mubr.msk.f32.mxu1 %vm712_vm3, %v713_v59 }
 0x1fa   :  { %v603_v61 = vpop.f32.mrb[0].mxu1 }
 0x1fb   :  { %v313_v63 = vadd.f32 %v603_v61, %v232_v60  ;;  %v307_v0 = vpop.f32.mrb[1].mxu1 }
 0x1fc   :  { %v308_v1 = vadd.f32 %v307_v0, %v227_v62 }
 0x1fd   :  { %v317_v2 = vmax.f32 %v313_v63, 0.0 }
 0x1fe   :  { %v316_v3 = vmax.f32 %v308_v1, 0.0 }
 0x200   :  { %v673_v4 = vpack.c.bf16 %v317_v2, %v316_v3 }
 0x202   :  { %674 = vmatpush3.bf16.msra.mxu1 %v673_v4 }
 0x203   :  { %611 = vmatprep.subr.mxu1 %v713_v59 }
 0x205   :  { %609 = vmatmul.mubr.msk.f32.vlgmr.msra.gmra.mrb[2].mxu1 %vm72_vm0, %v318_v5 }
 0x206   :  { %613 = vmatprep.mubr.msk.f32.mxu1 %vm712_vm3, %v713_v59 }
 0x2d8   :  { %v393_v7 = vpop.f32.mrb[2].mxu1 }
 0x2d9   :  { %v394_v8 = vadd.f32 %v393_v7, %v322_v6  ;;  %v610_v9 = vpop.f32.mrb[3].mxu1 }
 0x2db   :  { %v397_v10 = vmax.f32 %v394_v8, 0.0 }
 0x2dd   :  { %612 = vmatpush3.msra.mxu1 %v397_v10 }
 0x2de   :  { %614 = vmatmul.mubr.msk.f32.vlgmr.msra.gmra.mrb[4].mxu1 %vm404_vm4, %v398_v11 }
 0x3b1   :  { %v474_v13 = vpop.f32.mrb[4].mxu1 }
 0x3b2   :  { %v475_v14 = vadd.f32 %v474_v13, %v402_v12  ;;  %v615_v15 = vpop.f32.mrb[5].mxu1 }
 0x3b4   :  { %v523_v16 = vmul.f32 -1.442695, %v475_v14 }
 0x3b6   :  { %682 = vpow2.f32 %v523_v16 }
 0x3c0   :  { %v683_v17 = vpop.eup %682 }
 0x3c1   :  { %v481_v18 = vadd.f32 1.0, %v683_v17 }
 0x3c3   :  { %684 = vrcp.f32 %v481_v18 }
 0x3cd   :  { %v685_v19 = vpop.eup %684 }
 0x3ce   :  { %484 = vst [vmem:[#allocation2] sm:$0x1] %v685_v19 }
 0x3cf   :  { %697 = shalt.err (!%p694_p4)
}
 0x3d0   :  { %s698_s12 = scalar_lea.hbm %s911_s6, 16 }
 0x3d1   :  { %p699_p5 = scmp.ne.s32.totalorder %s911_s6, %s698_s12  ;;  %p702_p6 = scmp.lt.u32.totalorder %s698_s12, %s911_s6 }
 0x3d3   :  { %p704_p7 = pnand %p702_p6, %p699_p5 }
 0x3d5   :  { %707 = shalt.err (!%p704_p7)
}
 0x3d6   :  { %494 = dma.vmem_to_hbm [thread:$0]  %s492_s9, 16, %s911_s6, [#allocation3]  }
 0x3d7   :  { %708 = dma.done.wait [#allocation3], 16  }
 0x3d8   :  { %709 = vsyncadd [#allocation3], 4294967280 }
 0x3d9   :  { %498 = vsyncpa [#allocation3], 1 }

</bundles_post_ra>
